<compile_context>
chip_gen: v6e
topology: v6e:2x2x1
jax: 0.10.0
libtpu: 0.0.40
codegen_flags: <defaults>
</compile_context>

<pallas_src>
import functools

import jax
import jax.numpy as jnp
from jax.experimental import pallas as pl
from jax.experimental.pallas import tpu as pltpu


def mha_kernel(xq_ref, xk_ref, xv_ref,
               wqT_ref, bq_ref, wk_ref, bk_ref, wvT_ref, bv_ref,
               wmT_ref, bm_ref, out_ref, merged_ref, *, num_heads, head_dim):
    """One (batch, query-tile) grid step.

    Refs (VMEM):
      xq : (1, bn, d_model)   row-major query tile
      xk : (1, d_model, M)    channel-major keys (full length)
      xv : (1, M, d_model)    row-major values  (full length)
      wqT/wvT/wmT : (d_model, d_model)  (head-major permuted, transposed)
      wk          : (d_model, d_model)  (head-major permuted rows)
      bq/bv/bm : (1, d_model)   bk : (d_model, 1)
      out : (1, bn, d_model)
      merged_ref : (bn, d_model) f32 scratch accumulator
    """
    f32 = jnp.float32
    cdt = wqT_ref.dtype                    # MXU compute dtype (f32 or bf16)

    # 1x1 conv projections == channel matmuls.  All MXU-natural, no transposes.
    # The softmax scale is already folded into wqT / bq.
    q = (jnp.dot(xq_ref[0], wqT_ref[...], preferred_element_type=f32)
         + bq_ref[...]).astype(cdt)        # (bn, d_model), head-major columns
    k = (jnp.dot(wk_ref[...], xk_ref[0], preferred_element_type=f32)
         + bk_ref[...]).astype(cdt)        # (d_model, M), head-major rows
    v = (jnp.dot(xv_ref[0], wvT_ref[...], preferred_element_type=f32)
         + bv_ref[...]).astype(cdt)        # (M, d_model), head-major columns

    for h in range(num_heads):             # static, num_heads is small
        lo = h * head_dim
        hi = lo + head_dim
        qh = q[:, lo:hi]                   # (bn, hd)
        kh = k[lo:hi, :]                   # (hd, M)
        vh = v[:, lo:hi]                   # (M, hd)

        # scores[n, m] = sum_d qh[n, d] * kh[d, m]   (MXU-natural)
        s = jnp.dot(qh, kh, preferred_element_type=f32)        # (bn, M) f32
        s = s - jnp.max(s, axis=-1, keepdims=True)
        e = jnp.exp(s)
        denom = jnp.sum(e, axis=-1, keepdims=True)             # (bn, 1)

        # Unnormalized PV (MXU-natural), then fold the 1/denom into the small
        # (bn, hd) result instead of the (bn, M) probabilities.
        pv = jnp.dot(e.astype(cdt), vh, preferred_element_type=f32)
        merged_ref[:, lo:hi] = pv * pl.reciprocal(denom)

    y = jnp.dot(merged_ref[...].astype(cdt), wmT_ref[...],
                preferred_element_type=f32) + bm_ref[...]
    out_ref[0] = y.astype(out_ref.dtype)


def _pick_block_n(n, target=512):
    """Largest clean query-tile size that divides n (else the full length)."""
    if n <= target:
        return n
    for cand in (512, 256, 128):
        if cand <= target and n % cand == 0:
            return cand
    return n


def multi_headed_attention(xq, xk, xv, params, num_heads, *, mxu_dtype=None):
    """xq/xk/xv: (B, d_model, N) — the PyTorch Conv1d (NCL) layout."""
    B, d_model, Nq = xq.shape
    M = xk.shape[2]
    head_dim = d_model // num_heads
    Wq, bq, Wk, bk, Wv, bv, Wm, bm = params
    if mxu_dtype is None:
        mxu_dtype = xq.dtype

    f32 = jnp.float32
    scale = 1.0 / (head_dim ** 0.5)

    # Head-major permutation: new channel i = h*head_dim + d corresponds to
    # original channel d*num_heads + h (PyTorch .view(B, dim, heads, N)).
    idx = jnp.arange(d_model)
    perm = (idx % head_dim) * num_heads + (idx // head_dim)

    # Q/V consumed row-major (tokens x channels); K channel-major.
    # Softmax scale folded into the Q projection weight/bias.
    WqT = (Wq[perm] * scale).T.astype(mxu_dtype)         # (d_model, d_model)
    bq_r = (bq[perm] * scale).reshape(1, d_model).astype(f32)
    Wk_p = Wk[perm].astype(mxu_dtype)                    # (d_model, d_model)
    bk_c = bk[perm].reshape(d_model, 1).astype(f32)
    WvT = Wv[perm].T.astype(mxu_dtype)
    bv_r = bv[perm].reshape(1, d_model).astype(f32)
    WmT = Wm[:, perm].T.astype(mxu_dtype)                # consumes head-major cols
    bm_r = bm.reshape(1, d_model).astype(f32)

    # Layout plumbing outside the kernel: lane axis = d_model (lane-dense).
    xq_rm = jnp.transpose(xq, (0, 2, 1)).astype(mxu_dtype)   # (B, N, d_model)
    xk_cm = xk.astype(mxu_dtype)                             # (B, d_model, M)
    xv_rm = jnp.transpose(xv, (0, 2, 1)).astype(mxu_dtype)   # (B, M, d_model)

    bn = _pick_block_n(Nq)
    grid = (B, Nq // bn)

    kernel = functools.partial(mha_kernel, num_heads=num_heads,
                               head_dim=head_dim)

    q_spec = pl.BlockSpec((1, bn, d_model), lambda b, n: (b, n, 0))
    k_spec = pl.BlockSpec((1, d_model, M), lambda b, n: (b, 0, 0))
    v_spec = pl.BlockSpec((1, M, d_model), lambda b, n: (b, 0, 0))
    w_spec = pl.BlockSpec((d_model, d_model), lambda b, n: (0, 0))
    br_spec = pl.BlockSpec((1, d_model), lambda b, n: (0, 0))
    bc_spec = pl.BlockSpec((d_model, 1), lambda b, n: (0, 0))

    out_rm = pl.pallas_call(
        kernel,
        out_shape=jax.ShapeDtypeStruct((B, Nq, d_model), xq.dtype),
        grid_spec=pltpu.PrefetchScalarGridSpec(
            num_scalar_prefetch=0,
            grid=grid,
            in_specs=[q_spec, k_spec, v_spec,
                      w_spec, br_spec, w_spec, bc_spec, w_spec, br_spec,
                      w_spec, br_spec],
            out_specs=q_spec,
            scratch_shapes=[pltpu.VMEM((bn, d_model), jnp.float32)]),
        compiler_params=pltpu.CompilerParams(
            dimension_semantics=("parallel", "parallel"),
            vmem_limit_bytes=48 * 1024 * 1024),
    )(xq_rm, xk_cm, xv_rm, WqT, bq_r, Wk_p, bk_c, WvT, bv_r, WmT, bm_r)

    return jnp.transpose(out_rm, (0, 2, 1))   # back to (B, d_model, N)


def reference(xq, xk, xv, params, num_heads):
    """Pure-JAX replica of the PyTorch module's forward pass."""
    Wq, bq, Wk, bk, Wv, bv, Wm, bm = params
    B, d_model, N = xq.shape
    d = d_model // num_heads

    def conv1x1(W, b, x):
        return jnp.einsum('oi,bin->bon', W, x) + b[None, :, None]

    q = conv1x1(Wq, bq, xq).reshape(B, d, num_heads, N)
    k = conv1x1(Wk, bk, xk).reshape(B, d, num_heads, N)
    v = conv1x1(Wv, bv, xv).reshape(B, d, num_heads, N)
    scores = jnp.einsum('bdhn,bdhm->bhnm', q, k) / (d ** 0.5)
    prob = jax.nn.softmax(scores, axis=-1)
    x = jnp.einsum('bhnm,bdhm->bdhn', prob, v).reshape(B, d_model, N)
    return conv1x1(Wm, bm, x)


if __name__ == "__main__":
    B, num_heads, d_model, N = 2, 4, 32, 16

    key = jax.random.PRNGKey(0)
    ks = jax.random.split(key, 11)

    # Deterministic parameter init (Conv1d-like uniform(-1/sqrt(fan_in), ...)).
    bound = 1.0 / (d_model ** 0.5)

    def u(k, shape):
        return jax.random.uniform(k, shape, jnp.float32, -bound, bound)

    Wq, bq = u(ks[0], (d_model, d_model)), u(ks[1], (d_model,))
    Wk, bk = u(ks[2], (d_model, d_model)), u(ks[3], (d_model,))
    Wv, bv = u(ks[4], (d_model, d_model)), u(ks[5], (d_model,))
    Wm, bm = u(ks[6], (d_model, d_model)), u(ks[7], (d_model,))
    params = (Wq, bq, Wk, bk, Wv, bv, Wm, bm)

    xq = jax.random.normal(ks[8], (B, d_model, N), jnp.float32)
    xk = jax.random.normal(ks[9], (B, d_model, N), jnp.float32)
    xv = jax.random.normal(ks[10], (B, d_model, N), jnp.float32)

    ref = reference(xq, xk, xv, params, num_heads)

    # f32 MXU path: matches the f32 reference tightly.
    out = jax.block_until_ready(
        multi_headed_attention(xq, xk, xv, params, num_heads))
    max_err = float(jnp.max(jnp.abs(out - ref)))
    assert jnp.allclose(out, ref, atol=1e-4, rtol=1e-4), max_err

    # bf16 MXU path (production setting on v5e/v6e/v7x): matmul inputs bf16,
    # softmax + accumulation kept in f32.
    out_bf16 = jax.block_until_ready(
        multi_headed_attention(xq, xk, xv, params, num_heads,
                               mxu_dtype=jnp.bfloat16))
    max_err_bf16 = float(jnp.max(jnp.abs(out_bf16 - ref)))
    assert jnp.allclose(out_bf16, ref, atol=5e-2, rtol=5e-2), max_err_bf16

    print("KERNEL_OK")
</pallas_src>

<mosaic_0001>
module attributes {stable_mosaic.version = 11 : i64} {
  func.func @mha_kernel(%arg0: i32, %arg1: i32, %arg2: memref<1x16x32xf32, #tpu.memory_space<vmem>>, %arg3: memref<1x32x16xf32, #tpu.memory_space<vmem>>, %arg4: memref<1x16x32xf32, #tpu.memory_space<vmem>>, %arg5: memref<32x32xf32, #tpu.memory_space<vmem>>, %arg6: memref<1x32xf32, #tpu.memory_space<vmem>>, %arg7: memref<32x32xf32, #tpu.memory_space<vmem>>, %arg8: memref<32x1xf32, #tpu.memory_space<vmem>>, %arg9: memref<32x32xf32, #tpu.memory_space<vmem>>, %arg10: memref<1x32xf32, #tpu.memory_space<vmem>>, %arg11: memref<32x32xf32, #tpu.memory_space<vmem>>, %arg12: memref<1x32xf32, #tpu.memory_space<vmem>>, %arg13: memref<1x16x32xf32, #tpu.memory_space<vmem>>, %arg14: memref<16x32xf32, #tpu.memory_space<vmem>>) attributes {dimension_semantics = [#tpu.dimension_semantics<parallel>, #tpu.dimension_semantics<parallel>], iteration_bounds = array<i64: 2, 1>, scalar_prefetch = 0 : i64, scratch_operands = 1 : i64, tpu.core_type = #tpu.core_type<tc>, window_params = [{transform_indices = @transform_0, window_bounds = array<i64: 1, 16, 32>}, {transform_indices = @transform_1, window_bounds = array<i64: 1, 32, 16>}, {transform_indices = @transform_2, window_bounds = array<i64: 1, 16, 32>}, {pipeline_mode = #tpu.pipeline_mode<synchronous>, transform_indices = @transform_3, window_bounds = array<i64: 32, 32>}, {pipeline_mode = #tpu.pipeline_mode<synchronous>, transform_indices = @transform_4, window_bounds = array<i64: 1, 32>}, {pipeline_mode = #tpu.pipeline_mode<synchronous>, transform_indices = @transform_5, window_bounds = array<i64: 32, 32>}, {pipeline_mode = #tpu.pipeline_mode<synchronous>, transform_indices = @transform_6, window_bounds = array<i64: 32, 1>}, {pipeline_mode = #tpu.pipeline_mode<synchronous>, transform_indices = @transform_7, window_bounds = array<i64: 32, 32>}, {pipeline_mode = #tpu.pipeline_mode<synchronous>, transform_indices = @transform_8, window_bounds = array<i64: 1, 32>}, {pipeline_mode = #tpu.pipeline_mode<synchronous>, transform_indices = @transform_9, window_bounds = array<i64: 32, 32>}, {pipeline_mode = #tpu.pipeline_mode<synchronous>, transform_indices = @transform_10, window_bounds = array<i64: 1, 32>}, {transform_indices = @transform_11, window_bounds = array<i64: 1, 16, 32>}]} {
    %c0 = arith.constant 0 : index
    %c0_0 = arith.constant 0 : index
    %c0_1 = arith.constant 0 : index
    %0 = vector.load %arg2[%c0, %c0_0, %c0_1] : memref<1x16x32xf32, #tpu.memory_space<vmem>>, vector<1x16x32xf32>
    %1 = vector.shape_cast %0 : vector<1x16x32xf32> to vector<16x32xf32>
    %c0_2 = arith.constant 0 : index
    %c0_3 = arith.constant 0 : index
    %2 = vector.load %arg5[%c0_2, %c0_3] : memref<32x32xf32, #tpu.memory_space<vmem>>, vector<32x32xf32>
    %cst = arith.constant dense<0.000000e+00> : vector<16x32xf32>
    %3 = tpu.matmul %1, %2, %cst {dimension_numbers = #tpu.dot_dimension_numbers<[1], [0], [0], [1], [0, 0, 1, 1], [], []>} : vector<16x32xf32>, vector<32x32xf32>, vector<16x32xf32> -> vector<16x32xf32>
    %c0_4 = arith.constant 0 : index
    %c0_5 = arith.constant 0 : index
    %4 = vector.load %arg6[%c0_4, %c0_5] : memref<1x32xf32, #tpu.memory_space<vmem>>, vector<1x32xf32>
    %5 = vector.broadcast %4 : vector<1x32xf32> to vector<16x32xf32>
    %6 = arith.addf %3, %5 : vector<16x32xf32>
    %c0_6 = arith.constant 0 : index
    %c0_7 = arith.constant 0 : index
    %7 = vector.load %arg7[%c0_6, %c0_7] : memref<32x32xf32, #tpu.memory_space<vmem>>, vector<32x32xf32>
    %c0_8 = arith.constant 0 : index
    %c0_9 = arith.constant 0 : index
    %c0_10 = arith.constant 0 : index
    %8 = vector.load %arg3[%c0_8, %c0_9, %c0_10] : memref<1x32x16xf32, #tpu.memory_space<vmem>>, vector<1x32x16xf32>
    %9 = vector.shape_cast %8 : vector<1x32x16xf32> to vector<32x16xf32>
    %cst_11 = arith.constant dense<0.000000e+00> : vector<32x16xf32>
    %10 = tpu.matmul %7, %9, %cst_11 {dimension_numbers = #tpu.dot_dimension_numbers<[1], [0], [0], [1], [0, 0, 1, 1], [], []>} : vector<32x32xf32>, vector<32x16xf32>, vector<32x16xf32> -> vector<32x16xf32>
    %c0_12 = arith.constant 0 : index
    %c0_13 = arith.constant 0 : index
    %11 = vector.load %arg8[%c0_12, %c0_13] : memref<32x1xf32, #tpu.memory_space<vmem>>, vector<32x1xf32>
    %12 = vector.broadcast %11 : vector<32x1xf32> to vector<32x16xf32>
    %13 = arith.addf %10, %12 : vector<32x16xf32>
    %c0_14 = arith.constant 0 : index
    %c0_15 = arith.constant 0 : index
    %c0_16 = arith.constant 0 : index
    %14 = vector.load %arg4[%c0_14, %c0_15, %c0_16] : memref<1x16x32xf32, #tpu.memory_space<vmem>>, vector<1x16x32xf32>
    %15 = vector.shape_cast %14 : vector<1x16x32xf32> to vector<16x32xf32>
    %c0_17 = arith.constant 0 : index
    %c0_18 = arith.constant 0 : index
    %16 = vector.load %arg9[%c0_17, %c0_18] : memref<32x32xf32, #tpu.memory_space<vmem>>, vector<32x32xf32>
    %cst_19 = arith.constant dense<0.000000e+00> : vector<16x32xf32>
    %17 = tpu.matmul %15, %16, %cst_19 {dimension_numbers = #tpu.dot_dimension_numbers<[1], [0], [0], [1], [0, 0, 1, 1], [], []>} : vector<16x32xf32>, vector<32x32xf32>, vector<16x32xf32> -> vector<16x32xf32>
    %c0_20 = arith.constant 0 : index
    %c0_21 = arith.constant 0 : index
    %18 = vector.load %arg10[%c0_20, %c0_21] : memref<1x32xf32, #tpu.memory_space<vmem>>, vector<1x32xf32>
    %19 = vector.broadcast %18 : vector<1x32xf32> to vector<16x32xf32>
    %20 = arith.addf %17, %19 : vector<16x32xf32>
    %21 = vector.extract_strided_slice %6 {offsets = [0, 0], sizes = [16, 8], strides = [1, 1]} : vector<16x32xf32> to vector<16x8xf32>
    %22 = vector.extract_strided_slice %13 {offsets = [0, 0], sizes = [8, 16], strides = [1, 1]} : vector<32x16xf32> to vector<8x16xf32>
    %23 = vector.extract_strided_slice %20 {offsets = [0, 0], sizes = [16, 8], strides = [1, 1]} : vector<16x32xf32> to vector<16x8xf32>
    %cst_22 = arith.constant dense<0.000000e+00> : vector<16x16xf32>
    %24 = tpu.matmul %21, %22, %cst_22 {dimension_numbers = #tpu.dot_dimension_numbers<[1], [0], [0], [1], [0, 0, 1, 1], [], []>} : vector<16x8xf32>, vector<8x16xf32>, vector<16x16xf32> -> vector<16x16xf32>
    %cst_23 = arith.constant dense<0xFF800000> : vector<16xf32>
    %25 = vector.multi_reduction <maximumf>, %24, %cst_23 [1] : vector<16x16xf32> to vector<16xf32>
    %26 = vector.shape_cast %25 : vector<16xf32> to vector<16x1xf32>
    %27 = vector.broadcast %26 : vector<16x1xf32> to vector<16x16xf32>
    %28 = arith.subf %24, %27 : vector<16x16xf32>
    %29 = math.exp %28 : vector<16x16xf32>
    %cst_24 = arith.constant dense<0.000000e+00> : vector<16xf32>
    %30 = vector.multi_reduction <add>, %29, %cst_24 [1] : vector<16x16xf32> to vector<16xf32>
    %31 = vector.shape_cast %30 : vector<16xf32> to vector<16x1xf32>
    %cst_25 = arith.constant dense<0.000000e+00> : vector<16x8xf32>
    %32 = tpu.matmul %29, %23, %cst_25 {dimension_numbers = #tpu.dot_dimension_numbers<[1], [0], [0], [1], [0, 0, 1, 1], [], []>} : vector<16x16xf32>, vector<16x8xf32>, vector<16x8xf32> -> vector<16x8xf32>
    %33 = tpu.reciprocal %31 : vector<16x1xf32> -> vector<16x1xf32>
    %34 = vector.broadcast %33 : vector<16x1xf32> to vector<16x8xf32>
    %35 = arith.mulf %32, %34 : vector<16x8xf32>
    %c0_26 = arith.constant 0 : index
    %c0_27 = arith.constant 0 : index
    %36 = vector.load %arg14[%c0_26, %c0_27] : memref<16x32xf32, #tpu.memory_space<vmem>>, vector<16x8xf32>
    tpu.vector_store %arg14[%c0_26, %c0_27], %35 {strides = array<i32>} : memref<16x32xf32, #tpu.memory_space<vmem>>, vector<16x8xf32>,
    %37 = vector.extract_strided_slice %6 {offsets = [0, 8], sizes = [16, 8], strides = [1, 1]} : vector<16x32xf32> to vector<16x8xf32>
    %38 = vector.extract_strided_slice %13 {offsets = [8, 0], sizes = [8, 16], strides = [1, 1]} : vector<32x16xf32> to vector<8x16xf32>
    %39 = vector.extract_strided_slice %20 {offsets = [0, 8], sizes = [16, 8], strides = [1, 1]} : vector<16x32xf32> to vector<16x8xf32>
    %cst_28 = arith.constant dense<0.000000e+00> : vector<16x16xf32>
    %40 = tpu.matmul %37, %38, %cst_28 {dimension_numbers = #tpu.dot_dimension_numbers<[1], [0], [0], [1], [0, 0, 1, 1], [], []>} : vector<16x8xf32>, vector<8x16xf32>, vector<16x16xf32> -> vector<16x16xf32>
    %cst_29 = arith.constant dense<0xFF800000> : vector<16xf32>
    %41 = vector.multi_reduction <maximumf>, %40, %cst_29 [1] : vector<16x16xf32> to vector<16xf32>
    %42 = vector.shape_cast %41 : vector<16xf32> to vector<16x1xf32>
    %43 = vector.broadcast %42 : vector<16x1xf32> to vector<16x16xf32>
    %44 = arith.subf %40, %43 : vector<16x16xf32>
    %45 = math.exp %44 : vector<16x16xf32>
    %cst_30 = arith.constant dense<0.000000e+00> : vector<16xf32>
    %46 = vector.multi_reduction <add>, %45, %cst_30 [1] : vector<16x16xf32> to vector<16xf32>
    %47 = vector.shape_cast %46 : vector<16xf32> to vector<16x1xf32>
    %cst_31 = arith.constant dense<0.000000e+00> : vector<16x8xf32>
    %48 = tpu.matmul %45, %39, %cst_31 {dimension_numbers = #tpu.dot_dimension_numbers<[1], [0], [0], [1], [0, 0, 1, 1], [], []>} : vector<16x16xf32>, vector<16x8xf32>, vector<16x8xf32> -> vector<16x8xf32>
    %49 = tpu.reciprocal %47 : vector<16x1xf32> -> vector<16x1xf32>
    %50 = vector.broadcast %49 : vector<16x1xf32> to vector<16x8xf32>
    %51 = arith.mulf %48, %50 : vector<16x8xf32>
    %c0_32 = arith.constant 0 : index
    %c8 = arith.constant 8 : index
    %52 = vector.load %arg14[%c0_32, %c8] : memref<16x32xf32, #tpu.memory_space<vmem>>, vector<16x8xf32>
    tpu.vector_store %arg14[%c0_32, %c8], %51 {strides = array<i32>} : memref<16x32xf32, #tpu.memory_space<vmem>>, vector<16x8xf32>,
    %53 = vector.extract_strided_slice %6 {offsets = [0, 16], sizes = [16, 8], strides = [1, 1]} : vector<16x32xf32> to vector<16x8xf32>
    %54 = vector.extract_strided_slice %13 {offsets = [16, 0], sizes = [8, 16], strides = [1, 1]} : vector<32x16xf32> to vector<8x16xf32>
    %55 = vector.extract_strided_slice %20 {offsets = [0, 16], sizes = [16, 8], strides = [1, 1]} : vector<16x32xf32> to vector<16x8xf32>
    %cst_33 = arith.constant dense<0.000000e+00> : vector<16x16xf32>
    %56 = tpu.matmul %53, %54, %cst_33 {dimension_numbers = #tpu.dot_dimension_numbers<[1], [0], [0], [1], [0, 0, 1, 1], [], []>} : vector<16x8xf32>, vector<8x16xf32>, vector<16x16xf32> -> vector<16x16xf32>
    %cst_34 = arith.constant dense<0xFF800000> : vector<16xf32>
    %57 = vector.multi_reduction <maximumf>, %56, %cst_34 [1] : vector<16x16xf32> to vector<16xf32>
    %58 = vector.shape_cast %57 : vector<16xf32> to vector<16x1xf32>
    %59 = vector.broadcast %58 : vector<16x1xf32> to vector<16x16xf32>
    %60 = arith.subf %56, %59 : vector<16x16xf32>
    %61 = math.exp %60 : vector<16x16xf32>
    %cst_35 = arith.constant dense<0.000000e+00> : vector<16xf32>
    %62 = vector.multi_reduction <add>, %61, %cst_35 [1] : vector<16x16xf32> to vector<16xf32>
    %63 = vector.shape_cast %62 : vector<16xf32> to vector<16x1xf32>
    %cst_36 = arith.constant dense<0.000000e+00> : vector<16x8xf32>
    %64 = tpu.matmul %61, %55, %cst_36 {dimension_numbers = #tpu.dot_dimension_numbers<[1], [0], [0], [1], [0, 0, 1, 1], [], []>} : vector<16x16xf32>, vector<16x8xf32>, vector<16x8xf32> -> vector<16x8xf32>
    %65 = tpu.reciprocal %63 : vector<16x1xf32> -> vector<16x1xf32>
    %66 = vector.broadcast %65 : vector<16x1xf32> to vector<16x8xf32>
    %67 = arith.mulf %64, %66 : vector<16x8xf32>
    %c0_37 = arith.constant 0 : index
    %c16 = arith.constant 16 : index
    %68 = vector.load %arg14[%c0_37, %c16] : memref<16x32xf32, #tpu.memory_space<vmem>>, vector<16x8xf32>
    tpu.vector_store %arg14[%c0_37, %c16], %67 {strides = array<i32>} : memref<16x32xf32, #tpu.memory_space<vmem>>, vector<16x8xf32>,
    %69 = vector.extract_strided_slice %6 {offsets = [0, 24], sizes = [16, 8], strides = [1, 1]} : vector<16x32xf32> to vector<16x8xf32>
    %70 = vector.extract_strided_slice %13 {offsets = [24, 0], sizes = [8, 16], strides = [1, 1]} : vector<32x16xf32> to vector<8x16xf32>
    %71 = vector.extract_strided_slice %20 {offsets = [0, 24], sizes = [16, 8], strides = [1, 1]} : vector<16x32xf32> to vector<16x8xf32>
    %cst_38 = arith.constant dense<0.000000e+00> : vector<16x16xf32>
    %72 = tpu.matmul %69, %70, %cst_38 {dimension_numbers = #tpu.dot_dimension_numbers<[1], [0], [0], [1], [0, 0, 1, 1], [], []>} : vector<16x8xf32>, vector<8x16xf32>, vector<16x16xf32> -> vector<16x16xf32>
    %cst_39 = arith.constant dense<0xFF800000> : vector<16xf32>
    %73 = vector.multi_reduction <maximumf>, %72, %cst_39 [1] : vector<16x16xf32> to vector<16xf32>
    %74 = vector.shape_cast %73 : vector<16xf32> to vector<16x1xf32>
    %75 = vector.broadcast %74 : vector<16x1xf32> to vector<16x16xf32>
    %76 = arith.subf %72, %75 : vector<16x16xf32>
    %77 = math.exp %76 : vector<16x16xf32>
    %cst_40 = arith.constant dense<0.000000e+00> : vector<16xf32>
    %78 = vector.multi_reduction <add>, %77, %cst_40 [1] : vector<16x16xf32> to vector<16xf32>
    %79 = vector.shape_cast %78 : vector<16xf32> to vector<16x1xf32>
    %cst_41 = arith.constant dense<0.000000e+00> : vector<16x8xf32>
    %80 = tpu.matmul %77, %71, %cst_41 {dimension_numbers = #tpu.dot_dimension_numbers<[1], [0], [0], [1], [0, 0, 1, 1], [], []>} : vector<16x16xf32>, vector<16x8xf32>, vector<16x8xf32> -> vector<16x8xf32>
    %81 = tpu.reciprocal %79 : vector<16x1xf32> -> vector<16x1xf32>
    %82 = vector.broadcast %81 : vector<16x1xf32> to vector<16x8xf32>
    %83 = arith.mulf %80, %82 : vector<16x8xf32>
    %c0_42 = arith.constant 0 : index
    %c24 = arith.constant 24 : index
    %84 = vector.load %arg14[%c0_42, %c24] : memref<16x32xf32, #tpu.memory_space<vmem>>, vector<16x8xf32>
    tpu.vector_store %arg14[%c0_42, %c24], %83 {strides = array<i32>} : memref<16x32xf32, #tpu.memory_space<vmem>>, vector<16x8xf32>,
    %c0_43 = arith.constant 0 : index
    %c0_44 = arith.constant 0 : index
    %85 = vector.load %arg14[%c0_43, %c0_44] : memref<16x32xf32, #tpu.memory_space<vmem>>, vector<16x32xf32>
    %c0_45 = arith.constant 0 : index
    %c0_46 = arith.constant 0 : index
    %86 = vector.load %arg11[%c0_45, %c0_46] : memref<32x32xf32, #tpu.memory_space<vmem>>, vector<32x32xf32>
    %cst_47 = arith.constant dense<0.000000e+00> : vector<16x32xf32>
    %87 = tpu.matmul %85, %86, %cst_47 {dimension_numbers = #tpu.dot_dimension_numbers<[1], [0], [0], [1], [0, 0, 1, 1], [], []>} : vector<16x32xf32>, vector<32x32xf32>, vector<16x32xf32> -> vector<16x32xf32>
    %c0_48 = arith.constant 0 : index
    %c0_49 = arith.constant 0 : index
    %88 = vector.load %arg12[%c0_48, %c0_49] : memref<1x32xf32, #tpu.memory_space<vmem>>, vector<1x32xf32>
    %89 = vector.broadcast %88 : vector<1x32xf32> to vector<16x32xf32>
    %90 = arith.addf %87, %89 : vector<16x32xf32>
    %c0_50 = arith.constant 0 : index
    %c0_51 = arith.constant 0 : index
    %c0_52 = arith.constant 0 : index
    %91 = vector.load %arg13[%c0_50, %c0_51, %c0_52] : memref<1x16x32xf32, #tpu.memory_space<vmem>>, vector<1x16x32xf32>
    %92 = vector.shape_cast %91 : vector<1x16x32xf32> to vector<16x32xf32>
    %93 = vector.shape_cast %90 : vector<16x32xf32> to vector<1x16x32xf32>
    tpu.vector_store %arg13[%c0_50, %c0_51, %c0_52], %93 {strides = array<i32>} : memref<1x16x32xf32, #tpu.memory_space<vmem>>, vector<1x16x32xf32>,
    return
  }
  func.func @transform_0(%arg0: i32, %arg1: i32) -> (i32, i32, i32) {
    %c0_i32 = arith.constant 0 : i32
    %c0_i32_0 = arith.constant 0 : i32
    return %arg0, %arg1, %c0_i32 : i32, i32, i32
  }
  func.func @transform_1(%arg0: i32, %arg1: i32) -> (i32, i32, i32) {
    %c0_i32 = arith.constant 0 : i32
    %c0_i32_0 = arith.constant 0 : i32
    %c0_i32_1 = arith.constant 0 : i32
    return %arg0, %c0_i32, %c0_i32_0 : i32, i32, i32
  }
  func.func @transform_2(%arg0: i32, %arg1: i32) -> (i32, i32, i32) {
    %c0_i32 = arith.constant 0 : i32
    %c0_i32_0 = arith.constant 0 : i32
    %c0_i32_1 = arith.constant 0 : i32
    return %arg0, %c0_i32, %c0_i32_0 : i32, i32, i32
  }
  func.func @transform_3(%arg0: i32, %arg1: i32) -> (i32, i32) {
    %c0_i32 = arith.constant 0 : i32
    %c0_i32_0 = arith.constant 0 : i32
    %c0_i32_1 = arith.constant 0 : i32
    return %c0_i32, %c0_i32_0 : i32, i32
  }
  func.func @transform_4(%arg0: i32, %arg1: i32) -> (i32, i32) {
    %c0_i32 = arith.constant 0 : i32
    %c0_i32_0 = arith.constant 0 : i32
    %c0_i32_1 = arith.constant 0 : i32
    return %c0_i32, %c0_i32_0 : i32, i32
  }
  func.func @transform_5(%arg0: i32, %arg1: i32) -> (i32, i32) {
    %c0_i32 = arith.constant 0 : i32
    %c0_i32_0 = arith.constant 0 : i32
    %c0_i32_1 = arith.constant 0 : i32
    return %c0_i32, %c0_i32_0 : i32, i32
  }
  func.func @transform_6(%arg0: i32, %arg1: i32) -> (i32, i32) {
    %c0_i32 = arith.constant 0 : i32
    %c0_i32_0 = arith.constant 0 : i32
    %c0_i32_1 = arith.constant 0 : i32
    return %c0_i32, %c0_i32_0 : i32, i32
  }
  func.func @transform_7(%arg0: i32, %arg1: i32) -> (i32, i32) {
    %c0_i32 = arith.constant 0 : i32
    %c0_i32_0 = arith.constant 0 : i32
    %c0_i32_1 = arith.constant 0 : i32
    return %c0_i32, %c0_i32_0 : i32, i32
  }
  func.func @transform_8(%arg0: i32, %arg1: i32) -> (i32, i32) {
    %c0_i32 = arith.constant 0 : i32
    %c0_i32_0 = arith.constant 0 : i32
    %c0_i32_1 = arith.constant 0 : i32
    return %c0_i32, %c0_i32_0 : i32, i32
  }
  func.func @transform_9(%arg0: i32, %arg1: i32) -> (i32, i32) {
    %c0_i32 = arith.constant 0 : i32
    %c0_i32_0 = arith.constant 0 : i32
    %c0_i32_1 = arith.constant 0 : i32
    return %c0_i32, %c0_i32_0 : i32, i32
  }
  func.func @transform_10(%arg0: i32, %arg1: i32) -> (i32, i32) {
    %c0_i32 = arith.constant 0 : i32
    %c0_i32_0 = arith.constant 0 : i32
    %c0_i32_1 = arith.constant 0 : i32
    return %c0_i32, %c0_i32_0 : i32, i32
  }
  func.func @transform_11(%arg0: i32, %arg1: i32) -> (i32, i32, i32) {
    %c0_i32 = arith.constant 0 : i32
    %c0_i32_0 = arith.constant 0 : i32
    return %arg0, %arg1, %c0_i32 : i32, i32, i32
  }
}

</mosaic_0001>

<bundles_post_ra>
// kernel: tpu_custom_call.1
= control target key start
LH: loop header
LB: loop body
LE: loop exit
PB: predicated region body
PF: predicated region fallthrough
CT: control target
= control target key end

     0   :  { %16 = vsyncpa [#allocation4], 0  ;;  %s2717_s0 = inlined_call_operand.vmem [shape: f32[2,16,32], index: 0, kind: input, shape index: {}]   ;;  %s2718_s1 = inlined_call_operand.vmem [shape: f32[2,32,16], index: 1, kind: input, shape index: {}]   ;;  %s2719_s2 = inlined_call_operand.vmem [shape: f32[2,16,32], index: 2, kind: input, shape index: {}]   ;;  %s2720_s3 = inlined_call_operand.vmem [shape: f32[32,32], index: 3, kind: input, shape index: {}]   ;;  %s2721_s4 = inlined_call_operand.vmem [shape: f32[1,32], index: 4, kind: input, shape index: {}]   ;;  %s2722_s5 = inlined_call_operand.hbm [shape: f32[32,32], index: 5, kind: input, shape index: {}]   ;;  %s2723_s6 = inlined_call_operand.vmem [shape: f32[32,1], index: 6, kind: input, shape index: {}]   ;;  %s2724_s7 = inlined_call_operand.hbm [shape: f32[32,32], index: 7, kind: input, shape index: {}]   ;;  %s2725_s8 = inlined_call_operand.vmem [shape: f32[1,32], index: 8, kind: input, shape index: {}]   ;;  %s2726_s9 = inlined_call_operand.hbm [shape: f32[32,32], index: 9, kind: input, shape index: {}]   ;;  %s2727_s10 = inlined_call_operand.vmem [shape: f32[1,32], index: 10, kind: input, shape index: {}]   ;;  %s2728_s11 = inlined_call_operand.hbm [shape: f32[2,16,32], index: 11, kind: output, shape index: {}]  }
   0x1   :  { %17 = vsyncpa [#allocation7], 0 }
   0x2   :  { %18 = vsyncpa [#allocation5], 0 }
   0x3   :  { %20 = vsyncpa [#allocation5 + $0x1], 0  ;;  %s2436_s17 = smov 0   ;;  %s2438_s18 = smov 0  }
   0x4   :  { %s2440_s19 = smov 0   ;;  %s2442_s20 = smov 0  }
   0x5   :  { %s2444_s21 = smov 0   ;;  %s2446_s22 = smov 0  }
   0x6 LB: > { %2731 = sst [smem:[#allocation13_spill]] %s2356_s21  ;;  %s1863_s23 = sadd.s32 4294967295, %s2360_s22   ;;  %s2360_s22 = sphi %s2446_s22, %s26_s22   ;;  %s2356_s21 = sphi %s2444_s21, %s2742_s21   ;;  %s2352_s20 = sphi %s2442_s20, %s2741_s20   ;;  %s2348_s19 = sphi %s2440_s19, %s2745_s19   ;;  %s2344_s18 = sphi %s2438_s18, %s2744_s18   ;;  %s2340_s17 = sphi %s2436_s17, %s2743_s17  }
   0x7   : > { %s1864_s24 = sadd.s32 4294967294, %s2360_s22   ;;  %s38_s25 = sadd.s32 1, %s2356_s21 }
   0x8   : > { %s295_s26 = sadd.s32 1, %s2348_s19  ;;  %p40_p0 = scmp.ge.s32.totalorder %s38_s25, 2 }
   0x9   : > { %p305_p1 = scmp.ne.s32.totalorder %s2348_s19, %s2344_s18  ;;  %p306_p2 = scmp.eq.s32.totalorder %s1863_s23, 1 }
   0xa   : > { %p311_p3 = scmp.ne.s32.totalorder %s2344_s18, %s2340_s17  ;;  %s2747_s25 = smov (%p40_p0, %s38_s25), 0 }
   0xb   : > { %2732 = sst [smem:[#allocation14_spill]] %s2747_s25  ;;  %p2476_p4 = por %p306_p2, %p305_p1 }
   0xc   : > { %p312_p5 = scmp.eq.s32.totalorder %s1864_s24, 1  ;;  %s290_s28 = ssub.s32 %s2356_s21, %s2747_s25 }
   0xd   : > { %p1865_p6 = scmp.ge.s32.totalorder %s2360_s22, 1  ;;  %p293_p7 = scmp.eq.s32.totalorder %s290_s28, 0 }
   0xe   : > { %p2483_p8 = por %p312_p5, %p311_p3  ;;  %p319_p9 = scmp.lt.s32.totalorder %s2360_s22, 3 }
   0xf   : > { %s2489_s30 = scalar_select %p293_p7, %s2348_s19, %s295_s26  }
  0x10   : > { %s2734_s29 = scalar_select %p2483_p8, 1, 0 }
  0x11   : > { %2735 = sst [smem:[#allocation15_spill]] %s2489_s30  ;;  %p2491_p10 = pnand %p1865_p6, %p319_p9 }
  0x12   : > { %p2495_p11 = scmp.eq.s32.totalorder %s1863_s23, 0  ;;  %s2362_s14 = smov [#allocation6]  }
  0x13   : > { %p2082_p12 = pneg %p2491_p10  ;;  %s353_s15 = sshll.u32 %s2362_s14, 4  ;;  %s354_s15 = int_to_ptr.vmem [resolvable:$true] %s353_s15 }
  0x14   : > { %s2363_s24 = smov [#allocation3]   ;;  %s2209_s23 = scalar_lea.vmem %s354_s15, 512 }
  0x15   : > { %p2503_p13 = pnand %p2495_p11, %p2082_p12  ;;  %s337_s26 = sshll.u32 %s2363_s24, 4  ;;  %s338_s26 = int_to_ptr.vmem [resolvable:$true] %s337_s26 }
  0x16   : > { %p2210_p1 = scmp.ne.s32.totalorder %s354_s15, %s2209_s23  ;;  %p2217_p5 = scmp.lt.s32.totalorder %s354_s15, %s354_s15 }
  0x17   : > { %p2200_p0 = pneg %p2503_p13  ;;  %p2218_p6 = scmp.lt.s32.totalorder %s2209_s23, %s2209_s23 }
  0x19   : > { %p2212_p2 = pnand %p2210_p1, %p2200_p0  ;;  %p2219_p7 = por %p2218_p6, %p2217_p5 }
  0x1b   : > { %p2213_p3 = pneg %p2212_p2 }
  0x1d   : > { %p2220_p9 = pnand %p2219_p7, %p2213_p3 }
  0x1f   : > { %2223 = shalt.err (!%p2220_p9)
}
  0x20   : > { %s2364_s28 = smov 128   ;;  %s2365_s14 = smov 8  }
  0x21   : > { %2088 = dma.hbm_to_vmem [thread:$0]  (!%p2503_p13), %s2724_s7, 512, %s354_s15, [#allocation7], %s2364_s28, %s2364_s28, %s2365_s14  }
  0x22   : > { %s2235_s21 = scalar_lea.vmem %s338_s26, 512  ;;  %p2243_p8 = scmp.lt.s32.totalorder %s338_s26, %s338_s26 }
  0x23   : > { %p2236_p12 = scmp.ne.s32.totalorder %s338_s26, %s2235_s21  ;;  %p2244_p5 = scmp.lt.s32.totalorder %s2235_s21, %s2235_s21 }
  0x25   : > { %p2238_p1 = pnand %p2236_p12, %p2200_p0  ;;  %p2245_p3 = por %p2244_p5, %p2243_p8 }
  0x27   : > { %p2239_p2 = pneg %p2238_p1 }
  0x29   : > { %p2246_p6 = pnand %p2245_p3, %p2239_p2 }
  0x2b   : > { %2249 = shalt.err (!%p2246_p6)
}
  0x2c   : > { %2085 = dma.hbm_to_vmem [thread:$0]  (!%p2503_p13), %s2722_s5, 512, %s338_s26, [#allocation4], %s2364_s28, %s2364_s28, %s2365_s14  }
  0x2d   : > { %s2366_s25 = smov [#allocation8]  }
  0x2e   : > { %s369_s15 = sshll.u32 %s2366_s25, 4  ;;  %s370_s15 = int_to_ptr.vmem [resolvable:$true] %s369_s15 }
  0x2f   : > { %s2261_s24 = scalar_lea.vmem %s370_s15, 512  ;;  %p2269_p1 = scmp.lt.s32.totalorder %s370_s15, %s370_s15 }
  0x30   : > { %p2262_p7 = scmp.ne.s32.totalorder %s370_s15, %s2261_s24  ;;  %p2270_p8 = scmp.lt.s32.totalorder %s2261_s24, %s2261_s24 }
  0x32   : > { %p2264_p9 = pnand %p2262_p7, %p2200_p0  ;;  %p2271_p2 = por %p2270_p8, %p2269_p1 }
  0x34   : > { %p2265_p12 = pneg %p2264_p9 }
  0x36   : > { %p2272_p5 = pnand %p2271_p2, %p2265_p12 }
  0x38   : > { %2275 = shalt.err (!%p2272_p5)
}
  0x39   : > { %2091 = dma.hbm_to_vmem [thread:$0]  (!%p2503_p13), %s2726_s9, 512, %s370_s15, [#allocation7], %s2364_s28, %s2364_s28, %s2365_s14  }
  0x3a   : > { %417 = sbr.rel (%p2491_p10) target bundleno = 1288 (0x508), region = 64 }
  0x3f   : > { %2327 = dma.done.wait (%p2495_p11), [#allocation4], 512  }
  0x40   : > { %2329 = vsyncadd (%p2495_p11), [#allocation4], 4294966784 }
  0x41   : > { %2331 = dma.done.wait (%p2495_p11), [#allocation7], 1024  }
  0x42   : > { %2333 = vsyncadd (%p2495_p11), [#allocation7], 4294966272  ;;  %p480_p0 = scmp.lt.s32.totalorder %s2352_s20, 1  ;;  %v2367_v0 = vmov 0   ;;  %v505_v1 = vld [vmem:[%s2720_s3 + $0x18] sm:$0xff]  ;;  %v504_v3 = vld [vmem:[%s2720_s3 + $0x10] sm:$0xff] }
  0x43   : > { %2164 = vset.pattern.permute.xlu0 %v2367_v0  ;;  %2165 = vset.pattern.permute.xlu1 %v2367_v0  ;;  %v503_v5 = vld [vmem:[%s2720_s3 + $0x8] sm:$0xff]  ;;  %v502_v7 = vld [vmem:[%s2720_s3] sm:$0xff]  ;;  %vm513_vm0 = vcmask 261120   ;;  %v595_v10 = vld [vmem:[#allocation3] sm:$0xff]  ;;  %s2368_s13 = smov 120   ;;  %vm818_vm1 = vcmask 64512  }
  0x44   : > { %s481_s12 = scalar_select %p480_p0, %s2352_s20, 1  ;;  %1973 = vmatprep.subr.mxu0 %v505_v1  ;;  %v596_v12 = vld [vmem:[#allocation3 + $0x8] sm:$0xff]  ;;  %v603_v13 = vld [vmem:[%s2723_s6] sm:$0xff]  ;;  %1992 = vmatprep.mubr.msk.f32.mxu1 %vm513_vm0, %v595_v10  ;;  %v729_v15 = vld [vmem:[#allocation6 + $0x18] sm:$0xff]  ;;  %vm900_vm2 = vcmask 130048   ;;  %vm1208_vm3 = vcmask 130112  }
  0x45   : > { %1974 = vmatpush3.msra.mxu0 %v505_v1  ;;  %v597_v14 = vld [vmem:[#allocation3 + $0x10] sm:$0xff]  ;;  %v605_v17 = vld [vmem:[%s2723_s6 + $0x10] sm:$0xff]  ;;  %609 = vperm.xlu0 %2164, %v603_v13   ;;  %v598_v18 = vld [vmem:[#allocation3 + $0x18] sm:$0xff]  ;;  %s2371_s30 = smov 8   ;;  %vm1411_vm4 = vcmask 195712   ;;  %vm1614_vm5 = vcmask 261312  }
  0x46   : > { %s1916_s16 = sshll.u32 %s481_s12, 5  ;;  %s1915_s23 = sshll.u32 %s481_s12, 4  ;;  %1975 = vmatprep.subr.mxu0 %v504_v3  ;;  %v728_v19 = vld [vmem:[#allocation6 + $0x10] sm:$0xff]  ;;  %v604_v20 = vld [vmem:[%s2723_s6 + $0x8] sm:$0xff]  ;;  %v727_v21 = vld [vmem:[#allocation6 + $0x8] sm:$0xff]  ;;  %619 = vperm.xlu1 %2165, %v605_v17  }
  0x47   : > { %s493_s14 = scalar_lea.vmem %s2718_s1, %s1916_s16  ;;  %s487_s26 = scalar_lea.vmem %s2717_s0, %s1915_s23  ;;  %1976 = vmatpush3.msra.mxu0 %v504_v3  ;;  %v606_v22 = vld [vmem:[%s2723_s6 + $0x18] sm:$0xff]  ;;  %v726_v23 = vld [vmem:[#allocation6] sm:$0xff]  ;;  %v1881_v26 = vld [vmem:[%s2721_s4] ss:$0 sm:$0xff] }
  0x48   : > { %v602_v2 = vld [vmem:[%s493_s14 + $0x18] sm:$0xff]  ;;  %v601_v4 = vld [vmem:[%s493_s14 + $0x10] sm:$0xff]  ;;  %v600_v6 = vld [vmem:[%s493_s14 + $0x8] sm:$0xff]  ;;  %1977 = vmatprep.subr.mxu0 %v503_v5  ;;  %s2566_s24 = scalar_lea.vmem %s2719_s2, %s1915_s23  ;;  %s2370_s23 = smov 104  }
  0x49   : > { %1984 = vmatprep.subr.mxu1 %v602_v2  ;;  %v599_v8 = vld [vmem:[%s493_s14] sm:$0xff]  ;;  %1978 = vmatpush3.msra.mxu0 %v503_v5  ;;  %v501_v11 = vld [vmem:[%s487_s26 + $0x8] sm:$0xff]  ;;  %s2372_s12 = smov 16   ;;  %s2373_s16 = smov 24  }
  0x4a   : > { %1985 = vmatpush3.msra.mxu1 %v602_v2  ;;  %v500_v9 = vld [vmem:[%s487_s26] sm:$0xff]  ;;  %1979 = vmatprep.subr.mxu0 %v502_v7  ;;  %v725_v24 = vld [vmem:[%s2566_s24 + $0x8] sm:$0xff]  ;;  %s476_s26 = sand.u32 1, %s2344_s18   ;;  %s1918_s14 = sshll.u32 %s2352_s20, 8 }
  0x4b   : > { %1986 = vmatprep.subr.mxu1 %v601_v4  ;;  %1980 = vmatpush3.msra.mxu0 %v502_v7  ;;  %v724_v16 = vld [vmem:[%s2566_s24] sm:$0xff]  ;;  %s2369_s24 = smov 112   ;;  %s1874_s28 = sshll.u32 %s476_s26, 4 }
  0x4c   : > { %1987 = vmatpush3.msra.mxu1 %v601_v4  ;;  %1981 = vmatprep.mubr.msk.f32.mxu0 %vm513_vm0, %v500_v9  ;;  %v1888_v40 = vld [vmem:[%s2725_s8] ss:$0 sm:$0xff] }
  0x4d   : > { %1988 = vmatprep.subr.mxu1 %v600_v6  ;;  %1982 = vmatmul.mubr.msk.f32.vlgmr.msra.gmra.mxu0 %vm513_vm0, %v501_v11 }
  0x4e   : > { %1989 = vmatpush3.msra.mxu1 %v600_v6  ;;  %1998 = vmatprep.subr.mxu0 %v729_v15 }
  0x4f   : > { %1990 = vmatprep.subr.mxu1 %v599_v8  ;;  %2006 = vmatprep.mubr.msk.f32.mxu0 %vm513_vm0, %v724_v16 }
  0x50   : > { %1991 = vmatpush3.msra.mxu1 %v599_v8  ;;  %1999 = vmatpush3.msra.mxu0 %v729_v15 }
  0x51   : > { %1993 = vmatmul.mubr.msk.f32.vlgmr.msra.gmra.mxu1 %vm513_vm0, %v596_v12  ;;  %2000 = vmatprep.subr.mxu0 %v728_v19 }
  0x52   : > { %1995 = vmatprep.mubr.msk.f32.mxu1 %vm513_vm0, %v597_v14  ;;  %2001 = vmatpush3.msra.mxu0 %v728_v19 }
  0x53   : > { %614 = vperm.xlu0 %2164, %v604_v20   ;;  %2002 = vmatprep.subr.mxu0 %v727_v21 }
  0x54   : > { %2003 = vmatpush3.msra.mxu0 %v727_v21  ;;  %624 = vperm.xlu1 %2165, %v606_v22  }
  0x55   : > { %1996 = vmatmul.mubr.msk.f32.gmra.mxu1 %vm513_vm0, %v598_v18  ;;  %2004 = vmatprep.subr.mxu0 %v726_v23 }
  0x56   : > { %2005 = vmatpush3.msra.mxu0 %v726_v23 }
  0x57   : > { %2007 = vmatmul.mubr.msk.f32.vlgmr.msra.gmra.mxu0 %vm513_vm0, %v725_v24 }
  0xc0   : > { %v610_v25 = vpop.permute.xlu0 %609 }
  0xc1   : > { %v620_v37 = vpop.permute.xlu1 %619 }
  0xce   : > { %v615_v30 = vpop.permute.xlu0 %614 }
  0xcf   : > { %v625_v45 = vpop.permute.xlu1 %624 }
 0x10d   : > { %v1983_v27 = vpop.f32.mrf.mxu0 }
 0x10e   : > { %v592_v29 = vadd.f32 %v1983_v27, %v1881_v26 }
 0x10f   : > { %v586_v31 = vpop.f32.mrf.mxu0 }
 0x110   : > { %v587_v33 = vadd.f32 %v1881_v26, %v586_v31  ;;  %1008 = vrot.lane.b32.xlu1 %v592_v29, %s2368_s13 }
 0x111   : > { %v1994_v28 = vpop.f32.mrf.mxu1 }
 0x112   : > { %v711_v35 = vadd.f32 %v1994_v28, %v615_v30  ;;  %1006 = vrot.lane.b32.xlu0 %v587_v33, %s2368_s13  ;;  %2011 = vmatprep.mubr.msk.f32.mxu1 %vm818_vm1, %v587_v33 }
 0x113   : > { %v705_v32 = vpop.f32.mrf.mxu1 }
 0x114   : > { %v706_v34 = vadd.f32 %v705_v32, %v610_v25  ;;  %1213 = vrot.lane.b32.xlu1 %v592_v29, %s2369_s24 }
 0x115   : > { %v1997_v36 = vpop.f32.mrf.mxu1 }
 0x116   : > { %2009 = vmatprep.subr.mxu1 %v706_v34  ;;  %1211 = vrot.lane.b32.xlu0 %v587_v33, %s2369_s24  ;;  %v721_v48 = vadd.f32 %v1997_v36, %v625_v45 }
 0x117   : > { %2010 = vmatpush3.msra.mxu1 %v706_v34  ;;  %v715_v38 = vpop.f32.mrf.mxu1  ;;  %v2008_v41 = vpop.f32.mrf.mxu0 }
 0x118   : > { %2012 = vmatmul.mubr.msk.f32.vlgmr.msra.gmra.mxu1 %vm818_vm1, %v592_v29  ;;  %v716_v39 = vadd.f32 %v715_v38, %v620_v37  ;;  %2021 = vmatprep.subr.mxu1 %v711_v35  ;;  %v2601_v42 = vadd.f32 %v2008_v41, %v1888_v40 }
 0x119   : > { %2022 = vmatpush3.msra.mxu1 %v711_v35  ;;  %1416 = vrot.lane.b32.xlu1 %v592_v29, %s2370_s23  ;;  %v809_v43 = vpop.f32.mrf.mxu0 }
 0x11a   : > { %2033 = vmatprep.subr.mxu1 %v716_v39  ;;  %1414 = vrot.lane.b32.xlu0 %v587_v33, %s2370_s23  ;;  %v810_v44 = vadd.f32 %v1888_v40, %v809_v43 }
 0x11b   : > { %2014 = vmatprep.subr.mxu0 %v2601_v42 }
 0x11c   : > { %2015 = vmatpush3.msra.mxu0 %v2601_v42 }
 0x11d   : > { %1111 = vrot.lane.b32.xlu1 %v2601_v42, %s2368_s13  ;;  %2016 = vmatprep.subr.mxu0 %v810_v44 }
 0x11e   : > { %2017 = vmatpush3.msra.mxu0 %v810_v44  ;;  %1109 = vrot.lane.b32.xlu0 %v810_v44, %s2368_s13  ;;  %s478_s13 = scalar_lea.vmem [#allocation9], %s1874_s28  ;;  %s2374_s28 = smov [#allocation9]  }
 0x11f   : > { %s2280_s25 = sshll.u32 %s2374_s28, 4  ;;  %s2281_s25 = int_to_ptr.vmem [resolvable:$false] %s2280_s25 }
 0x120   : > { %s2282_s15 = scalar_lea.vmem %s2281_s25, 512 }
 0x121   : > { %1314 = vrot.lane.b32.xlu1 %v2601_v42, %s2369_s24 }
 0x125   : > { %1312 = vrot.lane.b32.xlu1 %v810_v44, %s2369_s24  ;;  %s1729_s24 = sshll.u32 %s478_s13, 4  ;;  %s2662_s24 = int_to_ptr.vmem [resolvable:$true] %s1729_s24 }
 0x126   : > { %s2276_s20 = scalar_lea.vmem %s2662_s24, 256  ;;  %p2283_p3 = scmp.lt.s32.totalorder %s2662_s24, %s2281_s25 }
 0x127   : > { %p2277_p10 = scmp.ne.s32.totalorder %s2662_s24, %s2276_s20  ;;  %p2284_p6 = scmp.lt.s32.totalorder %s2282_s15, %s2276_s20 }
 0x129   : > { %p2278_p11 = pnand %p2277_p10, %p2476_p4  ;;  %p2285_p7 = por %p2284_p6, %p2283_p3 }
 0x12b   : > { %p2279_p13 = pneg %p2278_p11 }
 0x12d   : > { %p2286_p9 = pnand %p2285_p7, %p2279_p13 }
 0x182   : > { %v1009_v46 = vpop.permute.xlu1 %1008 }
 0x184   : > { %v1007_v47 = vpop.permute.xlu0 %1006 }
 0x185   : > { %2023 = vmatprep.mubr.msk.f32.mxu1 %vm818_vm1, %v1007_v47 }
 0x186   : > { %2024 = vmatmul.mubr.msk.f32.vlgmr.msra.gmra.mxu1 %vm818_vm1, %v1009_v46  ;;  %v1214_v49 = vpop.permute.xlu1 %1213 }
 0x187   : > { %2034 = vmatpush3.msra.mxu1 %v716_v39 }
 0x188   : > { %2045 = vmatprep.subr.mxu1 %v721_v48  ;;  %v1212_v50 = vpop.permute.xlu0 %1211 }
 0x189   : > { %2035 = vmatprep.mubr.msk.f32.mxu1 %vm818_vm1, %v1212_v50 }
 0x18a   : > { %2036 = vmatmul.mubr.msk.f32.vlgmr.msra.gmra.mxu1 %vm818_vm1, %v1214_v49 }
 0x18b   : > { %2046 = vmatpush3.msra.mxu1 %v721_v48  ;;  %v1417_v52 = vpop.permute.xlu1 %1416 }
 0x18c   : > { %v1415_v51 = vpop.permute.xlu0 %1414 }
 0x18d   : > { %2047 = vmatprep.mubr.msk.f32.mxu1 %vm818_vm1, %v1415_v51 }
 0x18e   : > { %2048 = vmatmul.mubr.msk.f32.vlgmr.msra.gmra.mxu1 %vm818_vm1, %v1417_v52 }
 0x18f   : > { %v1112_v53 = vpop.permute.xlu1 %1111 }
 0x190   : > { %2026 = vmatprep.subr.mxu0 %v1112_v53  ;;  %v1110_v8 = vpop.permute.xlu0 %1109 }
 0x193   : > { %v1315_v6 = vpop.permute.xlu1 %1314 }
 0x197   : > { %v1313_v7 = vpop.permute.xlu1 %1312 }
 0x1d8   : > { %v2013_v54 = vpop.f32.mrf.mxu1 }
 0x1d9   : > { %v904_v55 = vsel %vm900_vm2, %v2013_v54, -inf }
 0x1da   : > { %905 = vmax.xlane.f32.xlu1 %v904_v55  ;;  %v891_v56 = vpop.f32.mrf.mxu1 }
 0x1db   : > { %v901_v57 = vsel %vm900_vm2, %v891_v56, -inf }
 0x1dc   : > { %902 = vmax.xlane.f32.xlu0 %v901_v57 }
 0x246   : > { %v2025_v58 = vpop.f32.mrf.mxu1 }
 0x247   : > { %v1092_v59 = vsel %vm900_vm2, %v2025_v58, -inf }
 0x248   : > { %v1080_v60 = vpop.f32.mrf.mxu1  ;;  %1093 = vmax.xlane.f32.xlu0 %v1092_v59 }
 0x249   : > { %v1089_v62 = vsel %vm900_vm2, %v1080_v60, -inf }
 0x24a   : > { %v2037_v61 = vpop.f32.mrf.mxu1 }
 0x24b   : > { %v1297_v2 = vsel %vm900_vm2, %v2037_v61, -inf }
 0x24c   : > { %v1285_v63 = vpop.f32.mrf.mxu1  ;;  %1090 = vmax.xlane.f32.xlu0 %v1089_v62 }
 0x24d   : > { %v1294_v0 = vsel %vm900_vm2, %v1285_v63, -inf }
 0x24e   : > { %v2049_v1 = vpop.f32.mrf.mxu1  ;;  %1295 = vmax.xlane.f32.xlu1 %v1294_v0 }
 0x24f   : > { %v1500_v5 = vsel %vm900_vm2, %v2049_v1, -inf }
 0x250   : > { %v1488_v3 = vpop.f32.mrf.mxu1  ;;  %1298 = vmax.xlane.f32.xlu0 %v1297_v2 }
 0x251   : > { %v1497_v4 = vsel %vm900_vm2, %v1488_v3, -inf }
 0x252   : > { %1498 = vmax.xlane.f32.xlu1 %v1497_v4 }
 0x254   : > { %1501 = vmax.xlane.f32.xlu0 %v1500_v5 }
 0x263   : > { %v906_v9 = vpop.xlane.xlu1 %905  ;;  %1515 = vrot.lane.b32.xlu1 %v810_v44, %s2370_s23 }
 0x264   : > { %v908_v10 = vsub.f32 %v2013_v54, %v906_v9  ;;  %v1621_v9 = vld [vmem:[#allocation8 + $0x10] sm:$0xff] }
 0x265   : > { %v903_v11 = vpop.xlane.xlu0 %902 }
 0x266   : > { %v907_v12 = vsub.f32 %v891_v56, %v903_v11  ;;  %v911_v13 = vmul.f32 1.442695, %v908_v10 }
 0x268   : > { %v909_v14 = vmul.f32 1.442695, %v907_v12  ;;  %v1620_v12 = vld [vmem:[#allocation8 + $0x8] sm:$0xff] }
 0x26a   : > { %2166 = vpow2.f32 %v909_v14  ;;  %1517 = vrot.lane.b32.xlu0 %v2601_v42, %s2370_s23 }
 0x26b   : > { %2168 = vpow2.f32 %v911_v13 }
 0x277   : > { %v2627_v15 = vpop.eup %2166 }
 0x278   : > { %v2629_v16 = vpop.eup %2168  ;;  %2018 = vmatprep.mubr.msk.f32.mxu0 %vm900_vm2, %v2627_v15  ;;  %v913_v48 = vsel %vm900_vm2, %v2627_v15, 0.0 }
 0x279   : > { %2019 = vmatmul.mubr.msk.f32.vlgmr.msra.gmra.mxu0 %vm900_vm2, %v2629_v16  ;;  %v916_v50 = vsel %vm900_vm2, %v2629_v16, 0.0  ;;  %v1619_v16 = vld [vmem:[#allocation8] sm:$0xff] }
 0x27a   : > { %2027 = vmatpush3.msra.mxu0 %v1112_v53 }
 0x27b   : > { %2028 = vmatprep.subr.mxu0 %v1110_v8 }
 0x27c   : > { %2029 = vmatpush3.msra.mxu0 %v1110_v8  ;;  %v1622_v8 = vld [vmem:[#allocation8 + $0x18] sm:$0xff] }
 0x27d   : > { %2038 = vmatprep.subr.mxu0 %v1315_v6  ;;  %2057 = vmatprep.subr.mxu1 %v1622_v8 }
 0x27e   : > { %2058 = vmatpush3.msra.mxu1 %v1622_v8 }
 0x27f   : > { %2059 = vmatprep.subr.mxu1 %v1621_v9 }
 0x280   : > { %2060 = vmatpush3.msra.mxu1 %v1621_v9 }
 0x281   : > { %2061 = vmatprep.subr.mxu1 %v1620_v12 }
 0x282   : > { %2062 = vmatpush3.msra.mxu1 %v1620_v12 }
 0x283   : > { %2063 = vmatprep.subr.mxu1 %v1619_v16 }
 0x284   : > { %2064 = vmatpush3.msra.mxu1 %v1619_v16 }
 0x2d1   : > { %v1094_v17 = vpop.xlane.xlu0 %1093 }
 0x2d2   : > { %v1096_v18 = vsub.f32 %v2025_v58, %v1094_v17 }
 0x2d4   : > { %v1099_v19 = vmul.f32 1.442695, %v1096_v18 }
 0x2d5   : > { %v1091_v20 = vpop.xlane.xlu0 %1090 }
 0x2d6   : > { %2170 = vpow2.f32 %v1099_v19  ;;  %v1095_v21 = vsub.f32 %v1080_v60, %v1091_v20 }
 0x2d7   : > { %v1296_v22 = vpop.xlane.xlu1 %1295 }
 0x2d8   : > { %v1097_v23 = vmul.f32 1.442695, %v1095_v21  ;;  %v1300_v24 = vsub.f32 %v1285_v63, %v1296_v22 }
 0x2d9   : > { %v1299_v25 = vpop.xlane.xlu0 %1298 }
 0x2da   : > { %2172 = vpow2.f32 %v1097_v23  ;;  %v1302_v26 = vmul.f32 1.442695, %v1300_v24  ;;  %v1301_v27 = vsub.f32 %v2037_v61, %v1299_v25 }
 0x2db   : > { %v1499_v28 = vpop.xlane.xlu1 %1498 }
 0x2dc   : > { %2174 = vpow2.f32 %v1302_v26  ;;  %v1304_v29 = vmul.f32 1.442695, %v1301_v27  ;;  %v1503_v30 = vsub.f32 %v1488_v3, %v1499_v28 }
 0x2dd   : > { %v1502_v31 = vpop.xlane.xlu0 %1501 }
 0x2de   : > { %2176 = vpow2.f32 %v1304_v29  ;;  %v1505_v32 = vmul.f32 1.442695, %v1503_v30  ;;  %v1504_v33 = vsub.f32 %v2049_v1, %v1502_v31  ;;  %v1907_v31 = vld [vmem:[%s2727_s10] ss:$0 sm:$0xff] }
 0x2df   : > { %v1516_v44 = vpop.permute.xlu1 %1515 }
 0x2e0   : > { %2178 = vpow2.f32 %v1505_v32  ;;  %v1507_v34 = vmul.f32 1.442695, %v1504_v33 }
 0x2e1   : > { %v1518_v41 = vpop.permute.xlu0 %1517 }
 0x2e2   : > { %2180 = vpow2.f32 %v1507_v34 }
 0x2e3   : > { %v2171_v35 = vpop.eup %2170 }
 0x2e4   : > { %v1104_v36 = vsel %vm900_vm2, %v2171_v35, 0.0 }
 0x2e5   : > { %1105 = vadd.xlane.f32.xlu1 %v1104_v36 }
 0x2e7   : > { %v2173_v37 = vpop.eup %2172 }
 0x2e8   : > { %2030 = vmatprep.mubr.msk.f32.mxu0 %vm900_vm2, %v2173_v37  ;;  %v1101_v38 = vsel %vm900_vm2, %v2173_v37, 0.0 }
 0x2e9   : > { %v2175_v39 = vpop.eup %2174  ;;  %2031 = vmatmul.mubr.msk.f32.vlgmr.msra.gmra.mxu0 %vm900_vm2, %v2171_v35  ;;  %1102 = vadd.xlane.f32.xlu0 %v1101_v38 }
 0x2ea   : > { %2039 = vmatpush3.msra.mxu0 %v1315_v6  ;;  %2042 = vmatprep.mubr.msk.f32.mxu0 %vm900_vm2, %v2175_v39  ;;  %v1306_v47 = vsel %vm900_vm2, %v2175_v39, 0.0 }
 0x2eb   : > { %v2177_v40 = vpop.eup %2176  ;;  %2040 = vmatprep.subr.mxu0 %v1313_v7 }
 0x2ec   : > { %2041 = vmatpush3.msra.mxu0 %v1313_v7  ;;  %v1309_v42 = vsel %vm900_vm2, %v2177_v40, 0.0 }
 0x2ed   : > { %v2179_v43 = vpop.eup %2178  ;;  %2050 = vmatprep.subr.mxu0 %v1518_v41  ;;  %2043 = vmatmul.mubr.msk.f32.vlgmr.msra.gmra.mxu0 %vm900_vm2, %v2177_v40 }
 0x2ee   : > { %1310 = vadd.xlane.f32.xlu0 %v1309_v42  ;;  %2051 = vmatpush3.msra.mxu0 %v1518_v41  ;;  %v1509_v45 = vsel %vm900_vm2, %v2179_v43, 0.0 }
 0x2ef   : > { %v2181_v46 = vpop.eup %2180  ;;  %2052 = vmatprep.subr.mxu0 %v1516_v44  ;;  %2054 = vmatprep.mubr.msk.f32.mxu0 %vm900_vm2, %v2179_v43 }
 0x2f0   : > { %1510 = vadd.xlane.f32.xlu1 %v1509_v45  ;;  %2053 = vmatpush3.msra.mxu0 %v1516_v44  ;;  %v1512_v49 = vsel %vm900_vm2, %v2181_v46, 0.0 }
 0x2f1   : > { %2055 = vmatmul.mubr.msk.f32.vlgmr.msra.gmra.mxu0 %vm900_vm2, %v2181_v46 }
 0x2f2   : > { %1307 = vadd.xlane.f32.xlu0 %v1306_v47 }
 0x2f4   : > { %914 = vadd.xlane.f32.xlu1 %v913_v48 }
 0x2f6   : > { %1513 = vadd.xlane.f32.xlu0 %v1512_v49 }
 0x2fa   : > { %917 = vadd.xlane.f32.xlu0 %v916_v50 }
 0x339   : > { %v2020_v59 = vpop.f32.mrf.mxu0 }
 0x33b   : > { %v991_v61 = vpop.f32.mrf.mxu0 }
 0x36e   : > { %v1106_v52 = vpop.xlane.xlu1 %1105 }
 0x372   : > { %v1103_v51 = vpop.xlane.xlu0 %1102 }
 0x377   : > { %v1311_v53 = vpop.xlane.xlu0 %1310 }
 0x379   : > { %v1511_v54 = vpop.xlane.xlu1 %1510 }
 0x37b   : > { %v1308_v55 = vpop.xlane.xlu0 %1307 }
 0x37d   : > { %v915_v56 = vpop.xlane.xlu1 %914 }
 0x37e   : > { %2182 = vrcp.f32 %v915_v56 }
 0x37f   : > { %v1514_v57 = vpop.xlane.xlu0 %1513 }
 0x383   : > { %v918_v58 = vpop.xlane.xlu0 %917 }
 0x384   : > { %2184 = vrcp.f32 %v918_v58 }
 0x385   : > { %2186 = vrcp.f32 %v1106_v52 }
 0x386   : > { %2188 = vrcp.f32 %v1103_v51 }
 0x387   : > { %2190 = vrcp.f32 %v1311_v53 }
 0x388   : > { %2192 = vrcp.f32 %v1511_v54 }
 0x389   : > { %2194 = vrcp.f32 %v1308_v55 }
 0x38a   : > { %2196 = vrcp.f32 %v1514_v57 }
 0x38b   : > { %v2183_v60 = vpop.eup %2182 }
 0x38c   : > { %v1002_v62 = vmul.f32 %v2183_v60, %v991_v61 }
 0x38e   : > { %1004 = vst.msk [vmem:[#allocation2] sm:$0xff] %vm818_vm1, %v1002_v62 }
 0x391   : > { %v2185_v63 = vpop.eup %2184 }
 0x392   : > { %v1003_v0 = vmul.f32 %v2185_v63, %v2020_v59  ;;  %v2187_v1 = vpop.eup %2186 }
 0x393   : > { %v2189_v4 = vpop.eup %2188 }
 0x394   : > { %1005 = vst.msk [vmem:[#allocation2 + $0x8] sm:$0xff] %vm818_vm1, %v1003_v0  ;;  %v2191_v10 = vpop.eup %2190 }
 0x395   : > { %v2193_v15 = vpop.eup %2192 }
 0x396   : > { %v2195_v17 = vpop.eup %2194 }
 0x397   : > { %v2197_v21 = vpop.eup %2196 }
 0x3a9   : > { %v2032_v2 = vpop.f32.mrf.mxu0 }
 0x3aa   : > { %v1199_v3 = vmul.f32 %v2187_v1, %v2032_v2 }
 0x3ab   : > { %v1187_v5 = vpop.f32.mrf.mxu0 }
 0x3ac   : > { %v1198_v6 = vmul.f32 %v2189_v4, %v1187_v5  ;;  %1204 = vrot.lane.b32.xlu0 %v1199_v3, %s2371_s30 }
 0x3ad   : > { %v2044_v7 = vpop.f32.mrf.mxu0 }
 0x3ae   : > { %1202 = vrot.lane.b32.xlu1 %v1198_v6, %s2371_s30  ;;  %v1402_v13 = vmul.f32 %v2191_v10, %v2044_v7 }
 0x3af   : > { %v1390_v11 = vpop.f32.mrf.mxu0 }
 0x3b0   : > { %v1401_v19 = vmul.f32 %v2195_v17, %v1390_v11 }
 0x3b1   : > { %v2056_v14 = vpop.f32.mrf.mxu0 }
 0x3b2   : > { %1407 = vrot.lane.b32.xlu1 %v1402_v13, %s2372_s12  ;;  %v1605_v22 = vmul.f32 %v2197_v21, %v2056_v14 }
 0x3b3   : > { %v1593_v18 = vpop.f32.mrf.mxu0 }
 0x3b4   : > { %v1604_v20 = vmul.f32 %v2193_v15, %v1593_v18 }
 0x3b6   : > { %1608 = vrot.lane.b32.xlu0 %v1604_v20, %s2373_s16  ;;  %1405 = vrot.lane.b32.xlu1 %v1401_v19, %s2372_s12  ;;  %s2668_s12 = scalar_lea.hbm %s2728_s11, %s1918_s14 }
 0x3ba   : > { %1610 = vrot.lane.b32.xlu1 %v1605_v22, %s2373_s16  ;;  %s2671_s16 = scalar_lea.sflag [#allocation5], %s476_s26 }
 0x41e   : > { %v1205_v23 = vpop.permute.xlu0 %1204 }
 0x41f   : > { %1210 = vst.msk [vmem:[#allocation2 + $0x8] sm:$0xff] %vm1208_vm3, %v1205_v23 }
 0x420   : > { %v1203_v24 = vpop.permute.xlu1 %1202 }
 0x421   : > { %1209 = vst.msk [vmem:[#allocation2] sm:$0xff] %vm1208_vm3, %v1203_v24 }
 0x424   : > { %v1408_v25 = vpop.permute.xlu1 %1407 }
 0x425   : > { %1413 = vst.msk [vmem:[#allocation2 + $0x8] sm:$0xff] %vm1411_vm4, %v1408_v25 }
 0x428   : > { %v1406_v26 = vpop.permute.xlu1 %1405  ;;  %v1609_v27 = vpop.permute.xlu0 %1608 }
 0x429   : > { %1412 = vst.msk [vmem:[#allocation2] sm:$0xff] %vm1411_vm4, %v1406_v26 }
 0x42a   : > { %1615 = vst.msk [vmem:[#allocation2] sm:$0xff] %vm1614_vm5, %v1609_v27 }
 0x42c   : > { %v1611_v28 = vpop.permute.xlu1 %1610 }
 0x42d   : > { %1616 = vst.msk [vmem:[#allocation2 + $0x8] sm:$0xff] %vm1614_vm5, %v1611_v28 }
 0x431   : > { %v1617_v29 = vld [vmem:[#allocation2] sm:$0xff] }
 0x432   : > { %2065 = vmatprep.mubr.msk.f32.mxu1 %vm513_vm0, %v1617_v29 }
 0x434   : > { %v1618_v30 = vld [vmem:[#allocation2 + $0x8] sm:$0xff] }
 0x435   : > { %2066 = vmatmul.mubr.msk.f32.vlgmr.msra.gmra.mxu1 %vm513_vm0, %v1618_v30 }
 0x4f5   : > { %v2067_v32 = vpop.f32.mrf.mxu1 }
 0x4f6   : > { %v1708_v33 = vadd.f32 %v2067_v32, %v1907_v31 }
 0x4f7   : > { %v1702_v34 = vpop.f32.mrf.mxu1 }
 0x4f8   : > { %1712 = vst.msk [vmem:[%s478_s13 + $0x8] sm:$0xff] %vm513_vm0, %v1708_v33  ;;  %v1703_v35 = vadd.f32 %v1907_v31, %v1702_v34 }
 0x4fa   : > { %1711 = vst.msk [vmem:[%s478_s13] sm:$0xff] %vm513_vm0, %v1703_v35 }
 0x4fb   : > { %2289 = shalt.err (!%p2286_p9)
}
 0x4fc   : > { %s2290_s26 = scalar_lea.hbm %s2668_s12, 256  ;;  %s2294_s21 = scalar_lea.hbm %s2728_s11, 512 }
 0x4fd   : > { %p2291_p12 = scmp.ne.s32.totalorder %s2668_s12, %s2290_s26  ;;  %p2295_p2 = scmp.lt.s32.totalorder %s2668_s12, %s2728_s11 }
 0x4fe   : > { %p2296_p5 = scmp.lt.s32.totalorder %s2294_s21, %s2290_s26 }
 0x4ff   : > { %p2292_p1 = pnand %p2291_p12, %p2476_p4 }
 0x500   : > { %p2297_p0 = por %p2296_p5, %p2295_p2 }
 0x501   : > { %p2293_p8 = pneg %p2292_p1 }
 0x503   : > { %p2298_p10 = pnand %p2297_p0, %p2293_p8 }
 0x505   : > { %2301 = shalt.err (!%p2298_p10)
}
 0x506   : > { %s2375_s20 = smov 128  }
 0x507   : > { %2080 = dma.vmem_to_hbm [thread:$0]  (%p2476_p4), %s2662_s24, 256, %s2668_s12, %s2671_s16, %s2375_s20, %s2375_s20, %s2371_s30  }
 0x508 PF: > { %p2102_p11 = scmp.ge.s32.totalorder %s2360_s22, 2  ;;  %s1744_s25 = sand.u32 1, %s2340_s17  }
 0x509   : > { %p2739_p13 = scmp.ne.s32.totalorder %s2734_s29, 0  ;;  %s1745_s15 = scalar_lea.sflag [#allocation5], %s1744_s25 }
 0x50b   : > { %p2093_p3 = pnand %p2102_p11, %p2739_p13 }
 0x50d   : > { %p2094_p6 = pneg %p2093_p3 }
 0x50f   : > { %2335 = dma.done.wait (%p2094_p6), %s1745_s15, 256  }
 0x510   : > { %2337 = vsyncadd (%p2094_p6), %s1745_s15, 4294967040  ;;  %s26_s22 = sadd.s32 1, %s2360_s22   ;;  %s2740_s27 = sld [smem:[#allocation15_spill]] }
 0x511   : > { %p23_p7 = scmp.ge.s32.totalorder %s26_s22, 4   ;;  %s2741_s20 = sld [smem:[#allocation13_spill]] }
 0x512   : > { %s2742_s21 = sld [smem:[#allocation14_spill]]  ;;  %s2743_s17 = smov %s2344_s18 }
 0x513   : > { %s2744_s18 = smov %s2348_s19  ;;  %25 = sbr.rel (!%p23_p7) target bundleno = 6 (0x6), region = 118 }
 0x516   : > { %s2745_s19 = smov %s2740_s27 }
 0x518   :  { %1750 = vsyncpa [#allocation4], 1 }
 0x519   :  { %1752 = vsyncpa [#allocation4 + $0x1], 1 }
 0x51a   :  { %1753 = vsyncpa [#allocation7], 1 }
 0x51b   :  { %1754 = vsyncpa [#allocation5], 1 }
 0x51c   :  { %1756 = vsyncpa [#allocation5 + $0x1], 1 }

</bundles_post_ra>
